<compile_context>
chip_gen: v6e
topology: v6e:2x2x1
jax: 0.10.0
libtpu: 0.0.40
codegen_flags: <defaults>
</compile_context>

<pallas_src>
import jax
import jax.numpy as jnp
from jax.experimental import pallas as pl
from jax.experimental.pallas import tpu as pltpu  # noqa: F401  (TPU backend)


def uniform_proposal_kernel(x_ref, w1_ref, aux_ref, out_ref):
    # x:   (1, D)    f32, lane-dense
    # w1:  (H, D)    bf16 in HBM/VMEM, lane-dense (nn.Linear (out, in) layout)
    # aux: (H+1, 3)  f32: [:, 0] = b1 ; [:H, 1:3] = W2 ; [H, 1:3] = b2
    # out: (1, 2)    f32: [sigmoid(modes_logit), softplus(certainty_logit)]
    H = aux_ref.shape[0] - 1

    x = x_ref[...]                                     # (1, D) f32
    w1 = w1_ref[...].astype(jnp.float32)               # (H, D) f32 (bf16 storage)

    aux = aux_ref[...]                                 # (H+1, 3) f32, single load
    b1 = aux[0:H, 0:1]                                 # (H, 1)
    w2 = aux[0:H, 1:3]                                 # (H, 2)
    b2 = aux[H:H + 1, 1:3]                             # (1, 2)

    # Layer 1: GEMV on the VPU (broadcast multiply) + XLU lane reduction.
    h = jnp.sum(w1 * x, axis=1, keepdims=True) + b1    # (H, 1)
    h = jnp.maximum(h, 0.0)                            # ReLU

    # Layer 2: only 2 output neurons -> broadcast multiply + sublane reduce.
    y = jnp.sum(h * w2, axis=0, keepdims=True) + b2    # (1, 2)

    # Column 0: sigmoid (stable, via tanh on the EUP).
    # Column 1: softplus (stable): max(y, 0) + log1p(exp(-|y|)).
    col = jax.lax.broadcasted_iota(jnp.int32, y.shape, 1)
    sig = 0.5 * (jnp.tanh(0.5 * y) + 1.0)
    sp = jnp.maximum(y, 0.0) + jnp.log1p(jnp.exp(-jnp.abs(y)))
    out_ref[...] = jnp.where(col == 0, sig, sp)        # one unmasked store


def prepare_uniform_proposal_params(w1, b1, w2, b2):
    """One-time parameter layout (do NOT call per forward).

    w1: (H, D)  fcn1 weight, nn.Linear (out, in) layout
    b1: (H,)    fcn1 bias
    w2: (2, H)  fcn2 weight, nn.Linear (out, in) layout
    b2: (2,)    fcn2 bias

    Returns:
      w1_bf16: (H, D)   bf16 lane-dense weights
      aux:     (H+1, 3) f32 packed [b1 | W2 | b2-row]
    """
    H, _ = w1.shape
    aux = jnp.zeros((H + 1, 3), jnp.float32)
    aux = aux.at[:H, 0].set(b1.astype(jnp.float32))
    aux = aux.at[:H, 1:3].set(w2.T.astype(jnp.float32))
    aux = aux.at[H, 1:3].set(b2.astype(jnp.float32))
    return w1.astype(jnp.bfloat16), aux


def uniform_proposal_forward(x, w1_bf16, aux):
    """Pallas implementation of UniformProposalLayer.forward (batch-1 view)."""
    x_flat = x.reshape(1, -1).astype(jnp.float32)      # matches x.view(1, -1)
    D = x_flat.shape[1]
    Hp1 = aux.shape[0]

    out = pl.pallas_call(
        uniform_proposal_kernel,
        out_shape=jax.ShapeDtypeStruct((1, 2), jnp.float32),
        in_specs=[
            pl.BlockSpec((1, D), lambda: (0, 0)),
            pl.BlockSpec((Hp1 - 1, D), lambda: (0, 0)),
            pl.BlockSpec((Hp1, 3), lambda: (0, 0)),
        ],
        out_specs=pl.BlockSpec((1, 2), lambda: (0, 0)),
    )(x_flat, w1_bf16, aux)

    # Match PyTorch return shapes: x[:, 0] and x[:, 1] -> shape (1,)
    return out[:, 0], out[:, 1]


def init_linear(key, in_dim, out_dim):
    """Deterministic init matching nn.Linear default (uniform +/- 1/sqrt(in)).

    Returns weight in (out_dim, in_dim) layout and bias of shape (out_dim,).
    """
    k_w, k_b = jax.random.split(key)
    bound = 1.0 / (in_dim ** 0.5)
    w = jax.random.uniform(k_w, (out_dim, in_dim), jnp.float32, -bound, bound)
    b = jax.random.uniform(k_b, (out_dim,), jnp.float32, -bound, bound)
    return w, b


if __name__ == "__main__":
    key = jax.random.PRNGKey(0)
    k_x, k_f1, k_f2 = jax.random.split(key, 3)

    # forward does x.view(1, -1), so input_dim = 2*4*16*16 = 2048.
    x = jax.random.normal(k_x, (2, 4, 16, 16), dtype=jnp.float32)
    input_dim = x.size                                   # 2048
    intermediate_dim = 2 * int(input_dim ** 0.5)         # 2 * 45 = 90

    w1, b1 = init_linear(k_f1, input_dim, intermediate_dim)   # (90, 2048), (90,)
    w2, b2 = init_linear(k_f2, intermediate_dim, 2)           # (2, 90),    (2,)

    # One-time parameter packing (hoisted out of the hot path).
    w1_bf16, aux = prepare_uniform_proposal_params(w1, b1, w2, b2)

    fwd = jax.jit(uniform_proposal_forward)
    modes, certainties = fwd(x, w1_bf16, aux)
    jax.block_until_ready((modes, certainties))

    # Pure-JAX reference (using the same bf16-stored W1, upcast to f32).
    xf = x.reshape(1, -1)
    w1_f32 = w1_bf16.astype(jnp.float32)
    h_ref = jnp.maximum(xf @ w1_f32.T + b1[None, :], 0.0)
    y_ref = h_ref @ w2.T + b2[None, :]
    modes_ref = jax.nn.sigmoid(y_ref[:, 0])
    cert_ref = jax.nn.softplus(y_ref[:, 1])
    assert jnp.allclose(modes, modes_ref, atol=1e-4), (modes, modes_ref)
    assert jnp.allclose(certainties, cert_ref, atol=1e-4), (certainties, cert_ref)

    # TODO(synk): for real throughput, batch many samples into one call so
    # layer 1 becomes an MXU matmul, or fuse this layer into the producer of x.
    print("KERNEL_OK")
</pallas_src>

<mosaic_0001>
module attributes {stable_mosaic.version = 11 : i64} {
  func.func @uniform_proposal_kernel(%arg0: memref<1x2048xf32, #tpu.memory_space<vmem>>, %arg1: memref<90x2048xbf16, #tpu.memory_space<vmem>>, %arg2: memref<91x3xf32, #tpu.memory_space<vmem>>, %arg3: memref<1x2xf32, #tpu.memory_space<vmem>>) attributes {dimension_semantics = [], scalar_prefetch = 0 : i64, scratch_operands = 0 : i64, tpu.core_type = #tpu.core_type<tc>} {
    %c0 = arith.constant 0 : index
    %c0_0 = arith.constant 0 : index
    %0 = vector.load %arg0[%c0, %c0_0] : memref<1x2048xf32, #tpu.memory_space<vmem>>, vector<1x2048xf32>
    %c0_1 = arith.constant 0 : index
    %c0_2 = arith.constant 0 : index
    %1 = vector.load %arg1[%c0_1, %c0_2] : memref<90x2048xbf16, #tpu.memory_space<vmem>>, vector<90x2048xbf16>
    %2 = arith.extf %1 : vector<90x2048xbf16> to vector<90x2048xf32>
    %c0_3 = arith.constant 0 : index
    %c0_4 = arith.constant 0 : index
    %3 = vector.load %arg2[%c0_3, %c0_4] : memref<91x3xf32, #tpu.memory_space<vmem>>, vector<91x3xf32>
    %4 = vector.extract_strided_slice %3 {offsets = [0, 0], sizes = [90, 1], strides = [1, 1]} : vector<91x3xf32> to vector<90x1xf32>
    %5 = vector.extract_strided_slice %3 {offsets = [0, 1], sizes = [90, 2], strides = [1, 1]} : vector<91x3xf32> to vector<90x2xf32>
    %6 = vector.extract_strided_slice %3 {offsets = [90, 1], sizes = [1, 2], strides = [1, 1]} : vector<91x3xf32> to vector<1x2xf32>
    %7 = vector.broadcast %0 : vector<1x2048xf32> to vector<90x2048xf32>
    %8 = arith.mulf %2, %7 : vector<90x2048xf32>
    %cst = arith.constant dense<0.000000e+00> : vector<90xf32>
    %9 = vector.multi_reduction <add>, %8, %cst [1] : vector<90x2048xf32> to vector<90xf32>
    %10 = vector.shape_cast %9 : vector<90xf32> to vector<90x1xf32>
    %11 = arith.addf %10, %4 : vector<90x1xf32>
    %cst_5 = arith.constant 0.000000e+00 : f32
    %12 = vector.broadcast %cst_5 : f32 to vector<90x1xf32>
    %13 = arith.maximumf %11, %12 : vector<90x1xf32>
    %14 = vector.broadcast %13 : vector<90x1xf32> to vector<90x2xf32>
    %15 = arith.mulf %14, %5 : vector<90x2xf32>
    %cst_6 = arith.constant dense<0.000000e+00> : vector<2xf32>
    %16 = vector.multi_reduction <add>, %15, %cst_6 [0] : vector<90x2xf32> to vector<2xf32>
    %17 = vector.shape_cast %16 : vector<2xf32> to vector<1x2xf32>
    %18 = arith.addf %17, %6 : vector<1x2xf32>
    %19 = tpu.iota {dimensions = array<i32: 1>} : vector<1x2xi32>
    %cst_7 = arith.constant 5.000000e-01 : f32
    %20 = vector.broadcast %cst_7 : f32 to vector<1x2xf32>
    %21 = arith.mulf %20, %18 : vector<1x2xf32>
    %22 = math.tanh %21 : vector<1x2xf32>
    %cst_8 = arith.constant 1.000000e+00 : f32
    %23 = vector.broadcast %cst_8 : f32 to vector<1x2xf32>
    %24 = arith.addf %22, %23 : vector<1x2xf32>
    %cst_9 = arith.constant 5.000000e-01 : f32
    %25 = vector.broadcast %cst_9 : f32 to vector<1x2xf32>
    %26 = arith.mulf %25, %24 : vector<1x2xf32>
    %cst_10 = arith.constant 0.000000e+00 : f32
    %27 = vector.broadcast %cst_10 : f32 to vector<1x2xf32>
    %28 = arith.maximumf %18, %27 : vector<1x2xf32>
    %29 = math.absf %18 : vector<1x2xf32>
    %cst_11 = arith.constant 0.000000e+00 : f32
    %30 = vector.broadcast %cst_11 : f32 to vector<1x2xf32>
    %31 = arith.subf %30, %29 : vector<1x2xf32>
    %32 = math.exp %31 : vector<1x2xf32>
    %33 = math.log1p %32 : vector<1x2xf32>
    %34 = arith.addf %28, %33 : vector<1x2xf32>
    %c0_i32 = arith.constant 0 : i32
    %35 = vector.broadcast %c0_i32 : i32 to vector<1x2xi32>
    %36 = arith.cmpi eq, %19, %35 : vector<1x2xi32>
    %37 = arith.select %36, %26, %34 : vector<1x2xi1>, vector<1x2xf32>
    %c0_12 = arith.constant 0 : index
    %c0_13 = arith.constant 0 : index
    %38 = vector.load %arg3[%c0_12, %c0_13] : memref<1x2xf32, #tpu.memory_space<vmem>>, vector<1x2xf32>
    tpu.vector_store %arg3[%c0_12, %c0_13], %37 {strides = array<i32>} : memref<1x2xf32, #tpu.memory_space<vmem>>, vector<1x2xf32>,
    return
  }
}

</mosaic_0001>

<bundles_post_ra>
// kernel: uniform_proposal_forward.1
= control target key start
LH: loop header
LB: loop body
LE: loop exit
PB: predicated region body
PF: predicated region fallthrough
CT: control target
= control target key end

     0   :  { %8 = vsyncpa [#allocation3], 0  ;;  %s1028_s12 = smov [#allocation2]   ;;  %s1394_s0 = inlined_call_operand.vmem [shape: f32[1,2048], index: 0, kind: input, shape index: {}]   ;;  %s1395_s1 = inlined_call_operand.hbm [shape: bf16[90,2048], index: 1, kind: input, shape index: {}]   ;;  %s1396_s2 = inlined_call_operand.vmem [shape: f32[91,3], index: 2, kind: input, shape index: {}]   ;;  %s1397_s3 = inlined_call_operand.vmem [shape: f32[1,2], index: 3, kind: output, shape index: {}]  }
   0x1   :  { %s16_s13 = sshll.u32 %s1028_s12, 4  ;;  %s17_s13 = int_to_ptr.vmem [resolvable:$true] %s16_s13 }
   0x2   :  { %s1014_s14 = scalar_lea.vmem %s17_s13, 12288  ;;  %p1019_p1 = scmp.lt.s32.totalorder %s17_s13, %s17_s13 }
   0x3   :  { %p1015_p0 = scmp.ne.s32.totalorder %s17_s13, %s1014_s14  ;;  %p1020_p2 = scmp.lt.s32.totalorder %s1014_s14, %s1014_s14 }
   0x5   :  { %p1021_p3 = por %p1020_p2, %p1019_p1 }
   0x7   :  { %p1022_p4 = pnand %p1021_p3, %p1015_p0 }
   0x9   :  { %1025 = shalt.err (!%p1022_p4)
}
   0xa   :  { %s1029_s15 = smov 1024   ;;  %s1030_s16 = smov 64  }
   0xb   :  { %22 = dma.hbm_to_vmem [thread:$0]  %s1395_s1, 12288, %s17_s13, [#allocation3], %s1029_s15, %s1029_s15, %s1030_s16  }
   0xc   :  { %1026 = dma.done.wait [#allocation3], 12288  }
   0xd   :  { %1027 = vsyncadd [#allocation3], 4294955008  ;;  %v332_v0 = vlaneseq  ;;  %v28_v4 = vld [vmem:[%s1394_s0] sm:$0xff]  ;;  %v47_v7 = vld [vmem:[#allocation2 + $0x88] sm:$0xff]  ;;  %vm791_vm0 = vcmask 1041408   ;;  %vm921_vm1 = vcmask 23560  }
   0xe   :  { %v46_v5 = vld [vmem:[#allocation2 + $0x80] sm:$0xff]  ;;  %v48_v13 = vld [vmem:[#allocation2 + $0x90] sm:$0xff]  ;;  %v160_v14 = vunpack.c.l.bf16 %v47_v7  ;;  %v49_v17 = vld [vmem:[#allocation2 + $0x98] sm:$0xff]  ;;  %v161_v21 = vunpack.c.h.bf16 %v47_v7  ;;  %vm943_vm2 = vcmask 17416   ;;  %vm986_vm5 = vcmask 8192  }
   0xf   :  { %v1057_v1 = vshrl.u32 %v332_v0, 7  ;;  %v158_v9 = vunpack.c.l.bf16 %v46_v5  ;;  %v159_v10 = vunpack.c.h.bf16 %v46_v5  ;;  %v50_v19 = vld [vmem:[#allocation2 + $0xa0] sm:$0xff]  ;;  %v1074_v20 = vld [vmem:[#allocation2 + $0xa8] sm:$0xff]  ;;  %v162_v25 = vunpack.c.l.bf16 %v48_v13  ;;  %v52_v28 = vld [vmem:[#allocation2 + $0xb0] sm:$0xff] }
  0x10   :  { %v163_v29 = vunpack.c.h.bf16 %v48_v13  ;;  %v164_v30 = vunpack.c.l.bf16 %v49_v17  ;;  %v30_v33 = vld [vmem:[#allocation2] sm:$0xff]  ;;  %v53_v34 = vld [vmem:[#allocation2 + $0xb8] sm:$0xff]  ;;  %v165_v35 = vunpack.c.h.bf16 %v49_v17  ;;  %v166_v36 = vunpack.c.l.bf16 %v50_v19  ;;  %v29_v39 = vld [vmem:[%s1394_s0 + $0x8] sm:$0xff] }
  0x11   :  { %v334_v2 = vsub.s32 0, %v1057_v1  ;;  %v338_v3 = vsub.s32 1, %v1057_v1  ;;  %v342_v6 = vsub.s32 2, %v1057_v1  ;;  %v346_v8 = vsub.s32 3, %v1057_v1  ;;  %v31_v44 = vld [vmem:[#allocation2 + $0x8] sm:$0xff]  ;;  %v32_v61 = vld [vmem:[#allocation2 + $0x10] sm:$0xff] }
  0x12   :  { %v350_v16 = vsub.s32 4, %v1057_v1  ;;  %v354_v18 = vsub.s32 5, %v1057_v1  ;;  %v358_v26 = vsub.s32 6, %v1057_v1  ;;  %v362_v27 = vsub.s32 7, %v1057_v1 }
  0x13   :  { %v1066_v11 = vrot.slane %v28_v4, %v334_v2  ;;  %v1068_v12 = vrot.slane %v28_v4, %v338_v3  ;;  %v1070_v15 = vrot.slane %v28_v4, %v342_v6  ;;  %v1076_v22 = vrot.slane %v28_v4, %v346_v8 }
  0x14   :  { %v1082_v31 = vrot.slane %v28_v4, %v350_v16  ;;  %v167_v37 = vunpack.c.h.bf16 %v50_v19  ;;  %v168_v38 = vunpack.c.l.bf16 %v1074_v20  ;;  %v169_v40 = vunpack.c.h.bf16 %v1074_v20  ;;  %v33_v19 = vld [vmem:[#allocation2 + $0x18] sm:$0xff] }
  0x15   :  { %v444_v23 = vmul.f32 %v1066_v11, %v158_v9  ;;  %v445_v24 = vmul.f32 %v1068_v12, %v159_v10  ;;  %v446_v32 = vmul.f32 %v1070_v15, %v160_v14  ;;  %v1090_v41 = vrot.slane %v28_v4, %v354_v18 }
  0x16   :  { %v447_v42 = vmul.f32 %v1076_v22, %v161_v21  ;;  %v170_v45 = vunpack.c.l.bf16 %v52_v28  ;;  %v171_v46 = vunpack.c.h.bf16 %v52_v28  ;;  %v126_v47 = vunpack.c.l.bf16 %v30_v33 }
  0x17   :  { %v638_v43 = vadd.f32 %v445_v24, %v444_v23  ;;  %v127_v48 = vunpack.c.h.bf16 %v30_v33  ;;  %v172_v49 = vunpack.c.l.bf16 %v53_v34  ;;  %v1093_v50 = vrot.slane %v28_v4, %v358_v26  ;;  %v54_v24 = vld [vmem:[#allocation2 + $0xc0] sm:$0xff] }
  0x18   :  { %v448_v51 = vmul.f32 %v1082_v31, %v162_v25  ;;  %v173_v53 = vunpack.c.h.bf16 %v53_v34  ;;  %v1096_v54 = vrot.slane %v28_v4, %v362_v27  ;;  %v1098_v55 = vrot.slane %v29_v39, %v334_v2 }
  0x19   :  { %v639_v52 = vadd.f32 %v638_v43, %v446_v32  ;;  %v128_v56 = vunpack.c.l.bf16 %v31_v44  ;;  %v1100_v57 = vrot.slane %v29_v39, %v338_v3  ;;  %v1102_v58 = vrot.slane %v29_v39, %v342_v6  ;;  %v35_v32 = vld [vmem:[#allocation2 + $0x28] sm:$0xff] }
  0x1a   :  { %v449_v59 = vmul.f32 %v1090_v41, %v163_v29  ;;  %v1105_v62 = vrot.slane %v29_v39, %v346_v8  ;;  %v129_v63 = vunpack.c.h.bf16 %v31_v44  ;;  %v412_v1 = vmul.f32 %v1066_v11, %v126_v47  ;;  %v34_v29 = vld [vmem:[#allocation2 + $0x20] sm:$0xff] }
  0x1b   :  { %v640_v60 = vadd.f32 %v639_v52, %v447_v42  ;;  %v413_v5 = vmul.f32 %v1068_v12, %v127_v48  ;;  %v1109_v4 = vrot.slane %v29_v39, %v350_v16  ;;  %v1111_v2 = vrot.slane %v29_v39, %v354_v18  ;;  %v37_v48 = vld [vmem:[#allocation2 + $0x38] sm:$0xff] }
  0x1c   :  { %v450_v3 = vmul.f32 %v1093_v50, %v164_v30  ;;  %v1114_v6 = vrot.slane %v29_v39, %v358_v26  ;;  %v1116_v9 = vrot.slane %v29_v39, %v362_v27  ;;  %v130_v10 = vunpack.c.l.bf16 %v32_v61  ;;  %v36_v39 = vld [vmem:[#allocation2 + $0x30] sm:$0xff] }
  0x1d   :  { %v641_v7 = vadd.f32 %v640_v60, %v448_v51  ;;  %v414_v8 = vmul.f32 %v1070_v15, %v128_v56  ;;  %v451_v13 = vmul.f32 %v1096_v54, %v165_v35  ;;  %v452_v14 = vmul.f32 %v1098_v55, %v166_v36  ;;  %v55_v36 = vld [vmem:[#allocation2 + $0xc8] sm:$0xff] }
  0x1e   :  { %v453_v17 = vmul.f32 %v1100_v57, %v167_v37  ;;  %v454_v18 = vmul.f32 %v1102_v58, %v168_v38  ;;  %v131_v20 = vunpack.c.h.bf16 %v32_v61  ;;  %v415_v21 = vmul.f32 %v1076_v22, %v129_v63  ;;  %v56_v61 = vld [vmem:[#allocation2 + $0xd0] sm:$0xff] }
  0x1f   :  { %v642_v16 = vadd.f32 %v641_v7, %v449_v59  ;;  %v604_v23 = vadd.f32 %v413_v5, %v412_v1  ;;  %v455_v25 = vmul.f32 %v1105_v62, %v169_v40  ;;  %v456_v26 = vmul.f32 %v1109_v4, %v170_v45 }
  0x20   :  { %v1127_v27 = vmul.f32 %v1111_v2, %v171_v46  ;;  %v1130_v30 = vmul.f32 %v1114_v6, %v172_v49  ;;  %v132_v33 = vunpack.c.l.bf16 %v33_v19  ;;  %v416_v34 = vmul.f32 %v1082_v31, %v130_v10 }
  0x21   :  { %v643_v28 = vadd.f32 %v642_v16, %v450_v3  ;;  %v605_v35 = vadd.f32 %v604_v23, %v414_v8  ;;  %v1134_v37 = vmul.f32 %v1116_v9, %v173_v53  ;;  %v174_v40 = vunpack.c.l.bf16 %v54_v24 }
  0x22   :  { %v175_v42 = vunpack.c.h.bf16 %v54_v24  ;;  %v133_v43 = vunpack.c.h.bf16 %v33_v19  ;;  %v134_v44 = vunpack.c.l.bf16 %v34_v29  ;;  %v417_v45 = vmul.f32 %v1090_v41, %v131_v20  ;;  %v57_v24 = vld [vmem:[#allocation2 + $0xd8] sm:$0xff] }
  0x23   :  { %v644_v38 = vadd.f32 %v643_v28, %v451_v13  ;;  %v606_v46 = vadd.f32 %v605_v35, %v415_v21  ;;  %v135_v49 = vunpack.c.h.bf16 %v34_v29  ;;  %v136_v51 = vunpack.c.l.bf16 %v35_v32 }
  0x24   :  { %v176_v52 = vunpack.c.l.bf16 %v55_v36  ;;  %v137_v56 = vunpack.c.h.bf16 %v35_v32  ;;  %v138_v59 = vunpack.c.l.bf16 %v36_v39  ;;  %v418_v60 = vmul.f32 %v1093_v50, %v132_v33 }
  0x25   :  { %v645_v47 = vadd.f32 %v644_v38, %v452_v14  ;;  %v607_v53 = vadd.f32 %v606_v46, %v416_v34  ;;  %v177_v1 = vunpack.c.h.bf16 %v55_v36  ;;  %v460_v5 = vmul.f32 %v1066_v11, %v174_v40 }
  0x26   :  { %v461_v3 = vmul.f32 %v1068_v12, %v175_v42  ;;  %v139_v7 = vunpack.c.h.bf16 %v36_v39  ;;  %v140_v10 = vunpack.c.l.bf16 %v37_v48  ;;  %v419_v8 = vmul.f32 %v1096_v54, %v133_v43  ;;  %v38_v39 = vld [vmem:[#allocation2 + $0x40] sm:$0xff] }
  0x27   :  { %v646_v63 = vadd.f32 %v645_v47, %v453_v17  ;;  %v608_v13 = vadd.f32 %v607_v53, %v417_v45  ;;  %v141_v16 = vunpack.c.h.bf16 %v37_v48  ;;  %v178_v19 = vunpack.c.l.bf16 %v56_v61  ;;  %v58_v42 = vld [vmem:[#allocation2 + $0xe0] sm:$0xff] }
  0x28   :  { %v462_v20 = vmul.f32 %v1070_v15, %v176_v52  ;;  %v420_v21 = vmul.f32 %v1098_v55, %v134_v44  ;;  %v421_v23 = vmul.f32 %v1100_v57, %v135_v49  ;;  %v179_v28 = vunpack.c.h.bf16 %v56_v61  ;;  %v39_v49 = vld [vmem:[#allocation2 + $0x48] sm:$0xff] }
  0x29   :  { %v647_v14 = vadd.f32 %v646_v63, %v454_v18  ;;  %v609_v17 = vadd.f32 %v608_v13, %v418_v60  ;;  %v422_v32 = vmul.f32 %v1102_v58, %v136_v51  ;;  %v463_v33 = vmul.f32 %v1076_v22, %v177_v1  ;;  %v59_v52 = vld [vmem:[#allocation2 + $0xe8] sm:$0xff] }
  0x2a   :  { %v655_v34 = vadd.f32 %v461_v3, %v460_v5  ;;  %v423_v35 = vmul.f32 %v1105_v62, %v137_v56  ;;  %v424_v18 = vmul.f32 %v1109_v4, %v138_v59  ;;  %v425_v36 = vmul.f32 %v1111_v2, %v139_v7  ;;  %v60_v5 = vld [vmem:[#allocation2 + $0xf0] sm:$0xff] }
  0x2b   :  { %v648_v29 = vadd.f32 %v647_v14, %v455_v25  ;;  %v610_v38 = vadd.f32 %v609_v17, %v419_v8  ;;  %v180_v43 = vunpack.c.l.bf16 %v57_v24  ;;  %v464_v44 = vmul.f32 %v1082_v31, %v178_v19  ;;  %v40_v14 = vld [vmem:[#allocation2 + $0x50] sm:$0xff] }
  0x2c   :  { %v656_v45 = vadd.f32 %v655_v34, %v462_v20  ;;  %v426_v25 = vmul.f32 %v1114_v6, %v140_v10  ;;  %v181_v47 = vunpack.c.h.bf16 %v57_v24  ;;  %v465_v48 = vmul.f32 %v1090_v41, %v179_v28 }
  0x2d   :  { %v649_v40 = vadd.f32 %v648_v29, %v456_v26  ;;  %v611_v46 = vadd.f32 %v610_v38, %v420_v21  ;;  %v142_v59 = vunpack.c.l.bf16 %v38_v39  ;;  %v143_v60 = vunpack.c.h.bf16 %v38_v39  ;;  %v61_v21 = vld [vmem:[#allocation2 + $0xf8] sm:$0xff] }
  0x2e   :  { %v657_v56 = vadd.f32 %v656_v45, %v463_v33  ;;  %v427_v26 = vmul.f32 %v1116_v9, %v141_v16  ;;  %v182_v61 = vunpack.c.l.bf16 %v58_v42  ;;  %v183_v63 = vunpack.c.h.bf16 %v58_v42  ;;  %v41_v42 = vld [vmem:[#allocation2 + $0x58] sm:$0xff] }
  0x2f   :  { %v650_v51 = vadd.f32 %v649_v40, %v1127_v27  ;;  %v612_v53 = vadd.f32 %v611_v46, %v421_v23  ;;  %v466_v3 = vmul.f32 %v1093_v50, %v180_v43  ;;  %v144_v10 = vunpack.c.l.bf16 %v39_v49 }
  0x30   :  { %v658_v7 = vadd.f32 %v657_v56, %v464_v44  ;;  %v184_v13 = vunpack.c.l.bf16 %v59_v52  ;;  %v467_v27 = vmul.f32 %v1096_v54, %v181_v47  ;;  %v145_v19 = vunpack.c.h.bf16 %v39_v49 }
  0x31   :  { %v651_v1 = vadd.f32 %v650_v51, %v1130_v30  ;;  %v613_v8 = vadd.f32 %v612_v53, %v422_v32  ;;  %v428_v23 = vmul.f32 %v1066_v11, %v142_v59  ;;  %v429_v17 = vmul.f32 %v1068_v12, %v143_v60 }
  0x32   :  { %v659_v16 = vadd.f32 %v658_v7, %v465_v48  ;;  %v185_v24 = vunpack.c.h.bf16 %v59_v52  ;;  %v186_v28 = vunpack.c.l.bf16 %v60_v5  ;;  %v187_v29 = vunpack.c.h.bf16 %v60_v5  ;;  %v70_v52 = vld [vmem:[#allocation2 + $0x140] sm:$0xff]  ;;  %v43_v7 = vld [vmem:[#allocation2 + $0x68] sm:$0xff] }
  0x33   :  { %v652_v20 = vadd.f32 %v651_v1, %v1134_v37  ;;  %v614_v30 = vadd.f32 %v613_v8, %v423_v35  ;;  %v468_v32 = vmul.f32 %v1098_v55, %v182_v61  ;;  %v146_v34 = vunpack.c.l.bf16 %v40_v14 }
  0x34   :  { %v660_v33 = vadd.f32 %v659_v16, %v466_v3  ;;  %v430_v38 = vmul.f32 %v1070_v15, %v144_v10  ;;  %v188_v40 = vunpack.c.l.bf16 %v61_v21  ;;  %v189_v37 = vunpack.c.h.bf16 %v61_v21  ;;  %v44_v16 = vld [vmem:[#allocation2 + $0x70] sm:$0xff] }
  0x35   :  { %653 = vadd.xlane.f32.xlu1 %v652_v20  ;;  %v615_v39 = vadd.f32 %v614_v30, %v424_v18  ;;  %v147_v43 = vunpack.c.h.bf16 %v40_v14  ;;  %v469_v44 = vmul.f32 %v1100_v57, %v183_v63  ;;  %v431_v35 = vmul.f32 %v1076_v22, %v145_v19  ;;  %v42_v18 = vld [vmem:[#allocation2 + $0x60] sm:$0xff] }
  0x36   :  { %v661_v45 = vadd.f32 %v660_v33, %v467_v27  ;;  %v621_v46 = vadd.f32 %v429_v17, %v428_v23  ;;  %v470_v48 = vmul.f32 %v1102_v58, %v184_v13  ;;  %v471_v49 = vmul.f32 %v1105_v62, %v185_v24 }
  0x37   :  { %v616_v47 = vadd.f32 %v615_v39, %v425_v36  ;;  %v472_v51 = vmul.f32 %v1109_v4, %v186_v28  ;;  %v148_v59 = vunpack.c.l.bf16 %v41_v42  ;;  %v432_v60 = vmul.f32 %v1082_v31, %v146_v34  ;;  %v71_v36 = vld [vmem:[#allocation2 + $0x148] sm:$0xff] }
  0x38   :  { %v662_v56 = vadd.f32 %v661_v45, %v468_v32  ;;  %v622_v53 = vadd.f32 %v621_v46, %v430_v38  ;;  %v473_v63 = vmul.f32 %v1111_v2, %v187_v29  ;;  %v149_v1 = vunpack.c.h.bf16 %v41_v42  ;;  %v72_v29 = vld [vmem:[#allocation2 + $0x150] sm:$0xff] }
  0x39   :  { %v617_v61 = vadd.f32 %v616_v47, %v426_v25  ;;  %v433_v5 = vmul.f32 %v1090_v41, %v147_v43  ;;  %v206_v8 = vunpack.c.l.bf16 %v70_v52  ;;  %v207_v13 = vunpack.c.h.bf16 %v70_v52 }
  0x3a   :  { %v663_v3 = vadd.f32 %v662_v56, %v469_v44  ;;  %v623_v10 = vadd.f32 %v622_v53, %v431_v35  ;;  %v474_v14 = vmul.f32 %v1114_v6, %v188_v40  ;;  %v475_v19 = vmul.f32 %v1116_v9, %v189_v37  ;;  %v73_v35 = vld [vmem:[#allocation2 + $0x158] sm:$0xff] }
  0x3b   :  { %v618_v27 = vadd.f32 %v617_v61, %v427_v26  ;;  %v150_v20 = vunpack.c.l.bf16 %v42_v18  ;;  %v434_v25 = vmul.f32 %v1093_v50, %v148_v59  ;;  %v208_v17 = vunpack.c.l.bf16 %v71_v36  ;;  %v45_v26 = vld [vmem:[#allocation2 + $0x78] sm:$0xff]  ;;  %v86_v61 = vld [vmem:[#allocation2 + $0x1c0] sm:$0xff] }
  0x3c   :  { %v664_v21 = vadd.f32 %v663_v3, %v470_v48  ;;  %v624_v23 = vadd.f32 %v623_v10, %v432_v60  ;;  %v151_v30 = vunpack.c.h.bf16 %v42_v18  ;;  %v152_v24 = vunpack.c.l.bf16 %v43_v7  ;;  %v74_v10 = vld [vmem:[#allocation2 + $0x160] sm:$0xff] }
  0x3d   :  { %619 = vadd.xlane.f32.xlu0 %v618_v27  ;;  %v435_v28 = vmul.f32 %v1096_v54, %v149_v1  ;;  %v209_v32 = vunpack.c.h.bf16 %v71_v36  ;;  %v492_v38 = vmul.f32 %v1066_v11, %v206_v8  ;;  %v493_v39 = vmul.f32 %v1068_v12, %v207_v13  ;;  %v87_v27 = vld [vmem:[#allocation2 + $0x1c8] sm:$0xff] }
  0x3e   :  { %v665_v33 = vadd.f32 %v664_v21, %v471_v49  ;;  %v625_v34 = vadd.f32 %v624_v23, %v433_v5  ;;  %v153_v40 = vunpack.c.h.bf16 %v43_v7  ;;  %v154_v37 = vunpack.c.l.bf16 %v44_v16 }
  0x3f   :  { %v155_v42 = vunpack.c.h.bf16 %v44_v16  ;;  %v436_v43 = vmul.f32 %v1098_v55, %v150_v20  ;;  %v210_v46 = vunpack.c.l.bf16 %v72_v29  ;;  %v494_v47 = vmul.f32 %v1070_v15, %v208_v17  ;;  %v75_v17 = vld [vmem:[#allocation2 + $0x168] sm:$0xff] }
  0x40   :  { %v666_v44 = vadd.f32 %v665_v33, %v472_v51  ;;  %v626_v45 = vadd.f32 %v625_v34, %v434_v25  ;;  %v156_v48 = vunpack.c.l.bf16 %v45_v26  ;;  %v157_v52 = vunpack.c.h.bf16 %v45_v26  ;;  %v76_v26 = vld [vmem:[#allocation2 + $0x170] sm:$0xff] }
  0x41   :  { %v437_v49 = vmul.f32 %v1100_v57, %v151_v30  ;;  %v211_v56 = vunpack.c.h.bf16 %v72_v29  ;;  %v495_v60 = vmul.f32 %v1076_v22, %v209_v32  ;;  %v689_v53 = vadd.f32 %v493_v39, %v492_v38 }
  0x42   :  { %v667_v18 = vadd.f32 %v666_v44, %v473_v63  ;;  %v627_v59 = vadd.f32 %v626_v45, %v435_v28  ;;  %v438_v1 = vmul.f32 %v1102_v58, %v152_v24  ;;  %v439_v51 = vmul.f32 %v1105_v62, %v153_v40  ;;  %v88_v40 = vld [vmem:[#allocation2 + $0x1d0] sm:$0xff] }
  0x43   :  { %v440_v5 = vmul.f32 %v1109_v4, %v154_v37  ;;  %v212_v36 = vunpack.c.l.bf16 %v73_v35  ;;  %v496_v8 = vmul.f32 %v1082_v31, %v210_v46  ;;  %v690_v13 = vadd.f32 %v689_v53, %v494_v47 }
  0x44   :  { %v668_v3 = vadd.f32 %v667_v18, %v474_v14  ;;  %v628_v7 = vadd.f32 %v627_v59, %v436_v43  ;;  %v441_v63 = vmul.f32 %v1111_v2, %v155_v42  ;;  %v213_v20 = vunpack.c.h.bf16 %v73_v35 }
  0x45   :  { %v238_v21 = vunpack.c.l.bf16 %v86_v61  ;;  %v239_v16 = vunpack.c.h.bf16 %v86_v61  ;;  %v497_v30 = vmul.f32 %v1090_v41, %v211_v56  ;;  %v691_v24 = vadd.f32 %v690_v13, %v495_v60  ;;  %v89_v61 = vld [vmem:[#allocation2 + $0x1d8] sm:$0xff] }
  0x46   :  { %v669_v25 = vadd.f32 %v668_v3, %v475_v19  ;;  %v629_v23 = vadd.f32 %v628_v7, %v437_v49  ;;  %v442_v28 = vmul.f32 %v1114_v6, %v156_v48  ;;  %v443_v14 = vmul.f32 %v1116_v9, %v157_v52  ;;  %v77_v19 = vld [vmem:[#allocation2 + $0x178] sm:$0xff] }
  0x47   :  { %v214_v29 = vunpack.c.l.bf16 %v74_v10  ;;  %v240_v32 = vunpack.c.l.bf16 %v87_v27  ;;  %v215_v34 = vunpack.c.h.bf16 %v74_v10  ;;  %v498_v38 = vmul.f32 %v1093_v50, %v212_v36 }
  0x48   :  { %670 = vadd.xlane.f32.xlu1 %v669_v25  ;;  %v630_v33 = vadd.f32 %v629_v23, %v438_v1  ;;  %v692_v39 = vadd.f32 %v691_v24, %v496_v8  ;;  %v216_v37 = vunpack.c.l.bf16 %v75_v17  ;;  %v241_v42 = vunpack.c.h.bf16 %v87_v27  ;;  %v102_v27 = vld [vmem:[#allocation2 + $0x240] sm:$0xff] }
  0x49   :  { %v524_v43 = vmul.f32 %v1066_v11, %v238_v21  ;;  %v525_v44 = vmul.f32 %v1068_v12, %v239_v16  ;;  %v217_v35 = vunpack.c.h.bf16 %v75_v17  ;;  %v499_v46 = vmul.f32 %v1096_v54, %v213_v20 }
  0x4a   :  { %v631_v45 = vadd.f32 %v630_v33, %v439_v51  ;;  %v693_v47 = vadd.f32 %v692_v39, %v497_v30  ;;  %v218_v48 = vunpack.c.l.bf16 %v76_v26  ;;  %v219_v52 = vunpack.c.h.bf16 %v76_v26  ;;  %v90_v30 = vld [vmem:[#allocation2 + $0x1e0] sm:$0xff] }
  0x4b   :  { %v242_v49 = vunpack.c.l.bf16 %v88_v40  ;;  %v526_v56 = vmul.f32 %v1070_v15, %v240_v32  ;;  %v220_v59 = vunpack.c.l.bf16 %v77_v19  ;;  %v500_v60 = vmul.f32 %v1098_v55, %v214_v29  ;;  %v103_v29 = vld [vmem:[#allocation2 + $0x248] sm:$0xff] }
  0x4c   :  { %v632_v18 = vadd.f32 %v631_v45, %v440_v5  ;;  %v694_v53 = vadd.f32 %v693_v47, %v498_v38  ;;  %v221_v1 = vunpack.c.h.bf16 %v77_v19  ;;  %v243_v36 = vunpack.c.h.bf16 %v88_v40  ;;  %v91_v19 = vld [vmem:[#allocation2 + $0x1e8] sm:$0xff] }
  0x4d   :  { %v527_v3 = vmul.f32 %v1076_v22, %v241_v42  ;;  %v723_v51 = vadd.f32 %v525_v44, %v524_v43  ;;  %v501_v10 = vmul.f32 %v1100_v57, %v215_v34  ;;  %v502_v8 = vmul.f32 %v1102_v58, %v216_v37  ;;  %v92_v37 = vld [vmem:[#allocation2 + $0x1f0] sm:$0xff] }
  0x4e   :  { %v633_v7 = vadd.f32 %v632_v18, %v441_v63  ;;  %v695_v13 = vadd.f32 %v694_v53, %v499_v46  ;;  %v503_v20 = vmul.f32 %v1105_v62, %v217_v35  ;;  %v244_v5 = vunpack.c.l.bf16 %v89_v61 }
  0x4f   :  { %v528_v21 = vmul.f32 %v1082_v31, %v242_v49  ;;  %v724_v16 = vadd.f32 %v723_v51, %v526_v56  ;;  %v504_v23 = vmul.f32 %v1109_v4, %v218_v48  ;;  %v245_v24 = vunpack.c.h.bf16 %v89_v61  ;;  %v93_v48 = vld [vmem:[#allocation2 + $0x1f8] sm:$0xff] }
  0x50   :  { %v634_v25 = vadd.f32 %v633_v7, %v442_v28  ;;  %v696_v17 = vadd.f32 %v695_v13, %v500_v60  ;;  %v529_v63 = vmul.f32 %v1090_v41, %v243_v36  ;;  %v270_v33 = vunpack.c.l.bf16 %v102_v27  ;;  %v105_v13 = vld [vmem:[#allocation2 + $0x258] sm:$0xff] }
  0x51   :  { %v725_v32 = vadd.f32 %v724_v16, %v527_v3  ;;  %v271_v26 = vunpack.c.h.bf16 %v102_v27  ;;  %v505_v38 = vmul.f32 %v1111_v2, %v219_v52  ;;  %v506_v39 = vmul.f32 %v1114_v6, %v220_v59 }
  0x52   :  { %v635_v34 = vadd.f32 %v634_v25, %v443_v14  ;;  %v697_v40 = vadd.f32 %v696_v17, %v501_v10  ;;  %v246_v28 = vunpack.c.l.bf16 %v90_v30  ;;  %v530_v42 = vmul.f32 %v1093_v50, %v244_v5  ;;  %v104_v14 = vld [vmem:[#allocation2 + $0x250] sm:$0xff] }
  0x53   :  { %v726_v43 = vadd.f32 %v725_v32, %v528_v21  ;;  %v272_v44 = vunpack.c.l.bf16 %v103_v29  ;;  %v507_v45 = vmul.f32 %v1116_v9, %v221_v1  ;;  %v247_v46 = vunpack.c.h.bf16 %v90_v30  ;;  %v106_v32 = vld [vmem:[#allocation2 + $0x260] sm:$0xff] }
  0x54   :  { %636 = vadd.xlane.f32.xlu0 %v635_v34  ;;  %v698_v35 = vadd.f32 %v697_v40, %v502_v8  ;;  %v531_v47 = vmul.f32 %v1096_v54, %v245_v24  ;;  %v273_v49 = vunpack.c.h.bf16 %v103_v29  ;;  %v556_v56 = vmul.f32 %v1066_v11, %v270_v33  ;;  %v62_v29 = vld [vmem:[#allocation2 + $0x100] sm:$0xff] }
  0x55   :  { %v727_v52 = vadd.f32 %v726_v43, %v529_v63  ;;  %v557_v18 = vmul.f32 %v1068_v12, %v271_v26  ;;  %v248_v60 = vunpack.c.l.bf16 %v91_v19  ;;  %v249_v53 = vunpack.c.h.bf16 %v91_v19 }
  0x56   :  { %v699_v59 = vadd.f32 %v698_v35, %v503_v20  ;;  %v250_v61 = vunpack.c.l.bf16 %v92_v37  ;;  %v532_v36 = vmul.f32 %v1098_v55, %v246_v28  ;;  %v274_v1 = vunpack.c.l.bf16 %v104_v14  ;;  %v63_v28 = vld [vmem:[#allocation2 + $0x108] sm:$0xff] }
  0x57   :  { %v728_v3 = vadd.f32 %v727_v52, %v530_v42  ;;  %v558_v51 = vmul.f32 %v1070_v15, %v272_v44  ;;  %v251_v10 = vunpack.c.h.bf16 %v92_v37  ;;  %v252_v8 = vunpack.c.l.bf16 %v93_v48  ;;  %v107_v52 = vld [vmem:[#allocation2 + $0x268] sm:$0xff] }
  0x58   :  { %v700_v7 = vadd.f32 %v699_v59, %v504_v23  ;;  %v275_v27 = vunpack.c.h.bf16 %v104_v14  ;;  %v533_v5 = vmul.f32 %v1100_v57, %v247_v46  ;;  %v559_v16 = vmul.f32 %v1076_v22, %v273_v49  ;;  %v108_v49 = vld [vmem:[#allocation2 + $0x270] sm:$0xff] }
  0x59   :  { %v729_v21 = vadd.f32 %v728_v3, %v531_v47  ;;  %v757_v20 = vadd.f32 %v557_v18, %v556_v56  ;;  %v253_v17 = vunpack.c.h.bf16 %v93_v48  ;;  %v534_v30 = vmul.f32 %v1102_v58, %v248_v60  ;;  %v109_v3 = vld [vmem:[#allocation2 + $0x278] sm:$0xff] }
  0x5a   :  { %v701_v25 = vadd.f32 %v700_v7, %v505_v38  ;;  %v535_v24 = vmul.f32 %v1105_v62, %v249_v53  ;;  %v276_v23 = vunpack.c.l.bf16 %v105_v13  ;;  %v560_v33 = vmul.f32 %v1082_v31, %v274_v1 }
  0x5b   :  { %v730_v63 = vadd.f32 %v729_v21, %v532_v36  ;;  %v758_v26 = vadd.f32 %v757_v20, %v558_v51  ;;  %v536_v40 = vmul.f32 %v1109_v4, %v250_v61  ;;  %v277_v19 = vunpack.c.h.bf16 %v105_v13  ;;  %v64_v61 = vld [vmem:[#allocation2 + $0x110] sm:$0xff] }
  0x5c   :  { %v702_v34 = vadd.f32 %v701_v25, %v506_v39  ;;  %v561_v37 = vmul.f32 %v1090_v41, %v275_v27  ;;  %v190_v43 = vunpack.c.l.bf16 %v62_v29  ;;  %v191_v44 = vunpack.c.h.bf16 %v62_v29 }
  0x5d   :  { %v731_v38 = vadd.f32 %v730_v63, %v533_v5  ;;  %v759_v42 = vadd.f32 %v758_v26, %v559_v16  ;;  %v537_v46 = vmul.f32 %v1111_v2, %v251_v10  ;;  %v538_v47 = vmul.f32 %v1114_v6, %v252_v8  ;;  %v65_v16 = vld [vmem:[#allocation2 + $0x118] sm:$0xff]  ;;  %v118_v26 = vld [vmem:[#allocation2 + $0x2c0] sm:$0x11] }
  0x5e   :  { %v703_v35 = vadd.f32 %v702_v34, %v507_v45  ;;  %v278_v14 = vunpack.c.l.bf16 %v106_v32  ;;  %v562_v39 = vmul.f32 %v1093_v50, %v276_v23  ;;  %v192_v18 = vunpack.c.l.bf16 %v63_v28 }
  0x5f   :  { %v732_v48 = vadd.f32 %v731_v38, %v534_v30  ;;  %v760_v56 = vadd.f32 %v759_v42, %v560_v33  ;;  %v539_v59 = vmul.f32 %v1116_v9, %v253_v17  ;;  %v279_v60 = vunpack.c.h.bf16 %v106_v32  ;;  %v66_v42 = vld [vmem:[#allocation2 + $0x120] sm:$0xff] }
  0x60   :  { %704 = vadd.xlane.f32.xlu1 %v703_v35  ;;  %v563_v53 = vmul.f32 %v1096_v54, %v277_v19  ;;  %v193_v45 = vunpack.c.h.bf16 %v63_v28  ;;  %v476_v51 = vmul.f32 %v1066_v11, %v190_v43  ;;  %v477_v7 = vmul.f32 %v1068_v12, %v191_v44  ;;  %v119_v35 = vld [vmem:[#allocation2 + $0x2c8] sm:$0x11] }
  0x61   :  { %v733_v36 = vadd.f32 %v732_v48, %v535_v24  ;;  %v761_v1 = vadd.f32 %v760_v56, %v561_v37  ;;  %v280_v10 = vunpack.c.l.bf16 %v107_v52  ;;  %v281_v8 = vunpack.c.h.bf16 %v107_v52 }
  0x62   :  { %v282_v13 = vunpack.c.l.bf16 %v108_v49  ;;  %v564_v27 = vmul.f32 %v1098_v55, %v278_v14  ;;  %v194_v20 = vunpack.c.l.bf16 %v64_v61  ;;  %v478_v25 = vmul.f32 %v1070_v15, %v192_v18  ;;  %v120_v18 = vld [vmem:[#allocation2 + $0x2d0] sm:$0x11] }
  0x63   :  { %v734_v5 = vadd.f32 %v733_v36, %v536_v40  ;;  %v762_v21 = vadd.f32 %v761_v1, %v562_v39  ;;  %v283_v17 = vunpack.c.h.bf16 %v108_v49  ;;  %v284_v30 = vunpack.c.l.bf16 %v109_v3 }
  0x64   :  { %v565_v24 = vmul.f32 %v1100_v57, %v279_v60  ;;  %v195_v29 = vunpack.c.h.bf16 %v64_v61  ;;  %v479_v23 = vmul.f32 %v1076_v22, %v193_v45  ;;  %v672_v33 = vadd.f32 %v477_v7, %v476_v51 }
  0x65   :  { %v735_v63 = vadd.f32 %v734_v5, %v537_v46  ;;  %v763_v32 = vadd.f32 %v762_v21, %v563_v53  ;;  %v285_v34 = vunpack.c.h.bf16 %v109_v3  ;;  %v566_v19 = vmul.f32 %v1102_v58, %v280_v10  ;;  %v67_v3 = vld [vmem:[#allocation2 + $0x128] sm:$0xff]  ;;  %v68_v5 = vld [vmem:[#allocation2 + $0x130] sm:$0xff] }
  0x66   :  { %v567_v40 = vmul.f32 %v1105_v62, %v281_v8  ;;  %v196_v37 = vunpack.c.l.bf16 %v65_v16  ;;  %v480_v43 = vmul.f32 %v1082_v31, %v194_v20  ;;  %v673_v44 = vadd.f32 %v672_v33, %v478_v25 }
  0x67   :  { %v736_v28 = vadd.f32 %v735_v63, %v538_v47  ;;  %v764_v38 = vadd.f32 %v763_v32, %v564_v27  ;;  %v568_v46 = vmul.f32 %v1109_v4, %v282_v13  ;;  %v197_v14 = vunpack.c.h.bf16 %v65_v16  ;;  %v121_v16 = vld [vmem:[#allocation2 + $0x2d8] sm:$0x11] }
  0x68   :  { %v481_v48 = vmul.f32 %v1090_v41, %v195_v29  ;;  %v302_v52 = vunpack.c.l.bf16 %v118_v26  ;;  %v674_v56 = vadd.f32 %v673_v44, %v479_v23  ;;  %v303_v60 = vunpack.c.h.bf16 %v118_v26 }
  0x69   :  { %v737_v49 = vadd.f32 %v736_v28, %v539_v59  ;;  %v765_v39 = vadd.f32 %v764_v38, %v565_v24  ;;  %v569_v53 = vmul.f32 %v1111_v2, %v283_v17  ;;  %v570_v47 = vmul.f32 %v1114_v6, %v284_v30  ;;  %v122_v38 = vld [vmem:[#allocation2 + $0x2e0] sm:$0x11] }
  0x6a   :  { %v198_v61 = vunpack.c.l.bf16 %v66_v42  ;;  %v304_v45 = vunpack.c.l.bf16 %v119_v35  ;;  %v482_v1 = vmul.f32 %v1093_v50, %v196_v37  ;;  %v675_v51 = vadd.f32 %v674_v56, %v480_v43 }
  0x6b   :  { %738 = vadd.xlane.f32.xlu1 %v737_v49  ;;  %v766_v36 = vadd.f32 %v765_v39, %v566_v19  ;;  %v305_v7 = vunpack.c.h.bf16 %v119_v35  ;;  %v571_v10 = vmul.f32 %v1116_v9, %v285_v34  ;;  %v199_v59 = vunpack.c.h.bf16 %v66_v42 }
  0x6c   :  { %v483_v8 = vmul.f32 %v1096_v54, %v197_v14  ;;  %v306_v13 = vunpack.c.l.bf16 %v120_v18  ;;  %v676_v21 = vadd.f32 %v675_v51, %v481_v48  ;;  %v588_v20 = vmul.f32 %v1066_v11, %v302_v52  ;;  %v69_v52 = vld [vmem:[#allocation2 + $0x138] sm:$0xff] }
  0x6d   :  { %v767_v27 = vadd.f32 %v766_v36, %v567_v40  ;;  %v589_v25 = vmul.f32 %v1068_v12, %v303_v60  ;;  %v200_v17 = vunpack.c.l.bf16 %v67_v3  ;;  %v201_v30 = vunpack.c.h.bf16 %v67_v3 }
  0x6e   :  { %v484_v24 = vmul.f32 %v1098_v55, %v198_v61  ;;  %v590_v29 = vmul.f32 %v1070_v15, %v304_v45  ;;  %v677_v32 = vadd.f32 %v676_v21, %v482_v1  ;;  %v307_v23 = vunpack.c.h.bf16 %v120_v18  ;;  %v78_v21 = vld [vmem:[#allocation2 + $0x180] sm:$0xff] }
  0x6f   :  { %v768_v63 = vadd.f32 %v767_v27, %v568_v46  ;;  %v591_v33 = vmul.f32 %v1076_v22, %v305_v7  ;;  %v202_v26 = vunpack.c.l.bf16 %v68_v5  ;;  %v485_v34 = vmul.f32 %v1100_v57, %v199_v59  ;;  %v123_v7 = vld [vmem:[#allocation2 + $0x2e8] sm:$0x11] }
  0x70   :  { %v308_v19 = vunpack.c.l.bf16 %v121_v16  ;;  %v592_v40 = vmul.f32 %v1082_v31, %v306_v13  ;;  %v678_v28 = vadd.f32 %v677_v32, %v483_v8  ;;  %v792_v42 = vsel %vm791_vm0, %v588_v20, 0.0  ;;  %v124_v32 = vld [vmem:[#allocation2 + $0x2f0] sm:$0x11] }
  0x71   :  { %v769_v37 = vadd.f32 %v768_v63, %v569_v53  ;;  %v793_v43 = vsel %vm791_vm0, %v589_v25, 0.0  ;;  %v486_v44 = vmul.f32 %v1102_v58, %v200_v17  ;;  %v309_v35 = vunpack.c.h.bf16 %v121_v16 }
  0x72   :  { %v794_v46 = vadd.f32 %v793_v43, %v792_v42  ;;  %v795_v14 = vsel %vm791_vm0, %v590_v29, 0.0  ;;  %v679_v49 = vadd.f32 %v678_v28, %v484_v24  ;;  %v593_v39 = vmul.f32 %v1090_v41, %v307_v23  ;;  %v79_v29 = vld [vmem:[#allocation2 + $0x188] sm:$0xff] }
  0x73   :  { %v770_v48 = vadd.f32 %v769_v37, %v570_v47  ;;  %v797_v56 = vsel %vm791_vm0, %v591_v33, 0.0  ;;  %v203_v18 = vunpack.c.h.bf16 %v68_v5  ;;  %v487_v60 = vmul.f32 %v1105_v62, %v201_v30 }
  0x74   :  { %v310_v53 = vunpack.c.l.bf16 %v122_v38  ;;  %v796_v61 = vadd.f32 %v795_v14, %v794_v46  ;;  %v680_v36 = vadd.f32 %v679_v49, %v485_v34  ;;  %v594_v3 = vmul.f32 %v1093_v50, %v308_v19  ;;  %v80_v14 = vld [vmem:[#allocation2 + $0x190] sm:$0xff] }
  0x75   :  { %v771_v45 = vadd.f32 %v770_v48, %v571_v10  ;;  %v799_v1 = vsel %vm791_vm0, %v592_v40, 0.0  ;;  %v204_v51 = vunpack.c.l.bf16 %v69_v52  ;;  %v488_v47 = vmul.f32 %v1109_v4, %v202_v26  ;;  %v125_v48 = vld [vmem:[#allocation2 + $0x2f8] sm:$0x11] }
  0x76   :  { %v798_v59 = vadd.f32 %v797_v56, %v796_v61  ;;  %v681_v8 = vadd.f32 %v680_v36, %v486_v44  ;;  %v311_v13 = vunpack.c.h.bf16 %v122_v38  ;;  %v595_v27 = vmul.f32 %v1096_v54, %v309_v35 }
  0x77   :  { %772 = vadd.xlane.f32.xlu1 %v771_v45  ;;  %v801_v5 = vsel %vm791_vm0, %v593_v39, 0.0  ;;  %v205_v16 = vunpack.c.h.bf16 %v69_v52  ;;  %v489_v10 = vmul.f32 %v1111_v2, %v203_v18  ;;  %v312_v17 = vunpack.c.l.bf16 %v123_v7 }
  0x78   :  { %v800_v20 = vadd.f32 %v799_v1, %v798_v59  ;;  %v682_v25 = vadd.f32 %v681_v8, %v487_v60  ;;  %v596_v30 = vmul.f32 %v1098_v55, %v310_v53  ;;  %v803_v24 = vsel %vm791_vm0, %v594_v3, 0.0  ;;  %v81_v59 = vld [vmem:[#allocation2 + $0x198] sm:$0xff] }
  0x79   :  { %v490_v63 = vmul.f32 %v1114_v6, %v204_v51  ;;  %v222_v33 = vunpack.c.l.bf16 %v78_v21  ;;  %v223_v26 = vunpack.c.h.bf16 %v78_v21  ;;  %v313_v19 = vunpack.c.h.bf16 %v123_v7  ;;  %v94_v21 = vld [vmem:[#allocation2 + $0x200] sm:$0xff] }
  0x7a   :  { %v802_v23 = vadd.f32 %v801_v5, %v800_v20  ;;  %v683_v34 = vadd.f32 %v682_v25, %v488_v47  ;;  %v597_v40 = vmul.f32 %v1100_v57, %v311_v13  ;;  %v805_v37 = vsel %vm791_vm0, %v595_v27, 0.0 }
  0x7b   :  { %v491_v28 = vmul.f32 %v1116_v9, %v205_v16  ;;  %v224_v42 = vunpack.c.l.bf16 %v79_v29  ;;  %v314_v44 = vunpack.c.l.bf16 %v124_v32  ;;  %v598_v35 = vmul.f32 %v1102_v58, %v312_v17 }
  0x7c   :  { %v804_v38 = vadd.f32 %v803_v24, %v802_v23  ;;  %v684_v43 = vadd.f32 %v683_v34, %v489_v10  ;;  %v807_v46 = vsel %vm791_vm0, %v596_v30, 0.0  ;;  %v225_v49 = vunpack.c.h.bf16 %v79_v29  ;;  %v95_v29 = vld [vmem:[#allocation2 + $0x208] sm:$0xff]  ;;  %v82_v23 = vld [vmem:[#allocation2 + $0x1a0] sm:$0xff] }
  0x7d   :  { %v508_v39 = vmul.f32 %v1066_v11, %v222_v33  ;;  %v509_v56 = vmul.f32 %v1068_v12, %v223_v26  ;;  %v315_v60 = vunpack.c.h.bf16 %v124_v32  ;;  %v599_v53 = vmul.f32 %v1105_v62, %v313_v19 }
  0x7e   :  { %v806_v52 = vadd.f32 %v805_v37, %v804_v38  ;;  %v685_v18 = vadd.f32 %v684_v43, %v490_v63  ;;  %v809_v61 = vsel %vm791_vm0, %v597_v40, 0.0  ;;  %v226_v36 = vunpack.c.l.bf16 %v80_v14 }
  0x7f   :  { %v510_v3 = vmul.f32 %v1070_v15, %v224_v42  ;;  %v316_v51 = vunpack.c.l.bf16 %v125_v48  ;;  %v600_v47 = vmul.f32 %v1109_v4, %v314_v44  ;;  %v811_v7 = vsel %vm791_vm0, %v598_v35, 0.0 }
  0x80   :  { %v808_v45 = vadd.f32 %v807_v46, %v806_v52  ;;  %v686_v1 = vadd.f32 %v685_v18, %v491_v28  ;;  %v227_v13 = vunpack.c.h.bf16 %v80_v14  ;;  %v511_v27 = vmul.f32 %v1076_v22, %v225_v49  ;;  %v96_v14 = vld [vmem:[#allocation2 + $0x210] sm:$0xff]  ;;  %v83_v52 = vld [vmem:[#allocation2 + $0x1a8] sm:$0xff] }
  0x81   :  { %v706_v5 = vadd.f32 %v509_v56, %v508_v39  ;;  %v317_v16 = vunpack.c.h.bf16 %v125_v48  ;;  %v601_v10 = vmul.f32 %v1111_v2, %v315_v60  ;;  %v813_v20 = vsel %vm791_vm0, %v599_v53, 0.0 }
  0x82   :  { %v810_v8 = vadd.f32 %v809_v61, %v808_v45  ;;  %687 = vadd.xlane.f32.xlu0 %v686_v1  ;;  %v228_v17 = vunpack.c.l.bf16 %v81_v59  ;;  %v512_v30 = vmul.f32 %v1082_v31, %v226_v36  ;;  %v602_v63 = vmul.f32 %v1114_v6, %v316_v51  ;;  %v84_v36 = vld [vmem:[#allocation2 + $0x1b0] sm:$0xff] }
  0x83   :  { %v707_v24 = vadd.f32 %v706_v5, %v510_v3  ;;  %v815_v32 = vsel %vm791_vm0, %v600_v47, 0.0  ;;  %v254_v33 = vunpack.c.l.bf16 %v94_v21  ;;  %v255_v26 = vunpack.c.h.bf16 %v94_v21 }
  0x84   :  { %v812_v25 = vadd.f32 %v811_v7, %v810_v8  ;;  %v229_v19 = vunpack.c.h.bf16 %v81_v59  ;;  %v513_v40 = vmul.f32 %v1090_v41, %v227_v13  ;;  %v603_v28 = vmul.f32 %v1116_v9, %v317_v16  ;;  %v97_v8 = vld [vmem:[#allocation2 + $0x218] sm:$0xff]  ;;  %v110_v16 = vld [vmem:[#allocation2 + $0x280] sm:$0xff] }
  0x85   :  { %v708_v37 = vadd.f32 %v707_v24, %v511_v27  ;;  %v817_v38 = vsel %vm791_vm0, %v601_v10, 0.0  ;;  %v256_v42 = vunpack.c.l.bf16 %v95_v29  ;;  %v230_v44 = vunpack.c.l.bf16 %v82_v23 }
  0x86   :  { %v814_v34 = vadd.f32 %v813_v20, %v812_v25  ;;  %v514_v35 = vmul.f32 %v1093_v50, %v228_v17  ;;  %v819_v48 = vsel %vm791_vm0, %v602_v63, 0.0  ;;  %v257_v49 = vunpack.c.h.bf16 %v95_v29  ;;  %v85_v20 = vld [vmem:[#allocation2 + $0x1b8] sm:$0xff] }
  0x87   :  { %v709_v46 = vadd.f32 %v708_v37, %v512_v30  ;;  %v540_v39 = vmul.f32 %v1066_v11, %v254_v33  ;;  %v541_v56 = vmul.f32 %v1068_v12, %v255_v26  ;;  %v231_v60 = vunpack.c.h.bf16 %v82_v23  ;;  %v111_v23 = vld [vmem:[#allocation2 + $0x288] sm:$0xff] }
  0x88   :  { %v816_v43 = vadd.f32 %v815_v32, %v814_v34  ;;  %v515_v53 = vmul.f32 %v1096_v54, %v229_v19  ;;  %v821_v45 = vsel %vm791_vm0, %v603_v28, 0.0  ;;  %v258_v3 = vunpack.c.l.bf16 %v96_v14  ;;  %v98_v34 = vld [vmem:[#allocation2 + $0x220] sm:$0xff] }
  0x89   :  { %v710_v61 = vadd.f32 %v709_v46, %v513_v40  ;;  %v542_v1 = vmul.f32 %v1070_v15, %v256_v42  ;;  %v232_v47 = vunpack.c.l.bf16 %v83_v52  ;;  %v516_v7 = vmul.f32 %v1098_v55, %v230_v44 }
  0x8a   :  { %v818_v18 = vadd.f32 %v817_v38, %v816_v43  ;;  %v233_v13 = vunpack.c.h.bf16 %v83_v52  ;;  %v259_v27 = vunpack.c.h.bf16 %v96_v14  ;;  %v543_v5 = vmul.f32 %v1076_v22, %v257_v49 }
  0x8b   :  { %v711_v59 = vadd.f32 %v710_v61, %v514_v35  ;;  %v740_v21 = vadd.f32 %v541_v56, %v540_v39  ;;  %v234_v25 = vunpack.c.l.bf16 %v84_v36  ;;  %v517_v17 = vmul.f32 %v1100_v57, %v231_v60  ;;  %v112_v39 = vld [vmem:[#allocation2 + $0x290] sm:$0xff] }
  0x8c   :  { %v820_v51 = vadd.f32 %v819_v48, %v818_v18  ;;  %v235_v24 = vunpack.c.h.bf16 %v84_v36  ;;  %v260_v29 = vunpack.c.l.bf16 %v97_v8  ;;  %v544_v63 = vmul.f32 %v1082_v31, %v258_v3  ;;  %v99_v18 = vld [vmem:[#allocation2 + $0x228] sm:$0xff] }
  0x8d   :  { %v712_v30 = vadd.f32 %v711_v59, %v515_v53  ;;  %v741_v32 = vadd.f32 %v740_v21, %v542_v1  ;;  %v518_v33 = vmul.f32 %v1102_v58, %v232_v47  ;;  %v286_v19 = vunpack.c.l.bf16 %v110_v16 }
  0x8e   :  { %v822_v10 = vadd.f32 %v821_v45, %v820_v51  ;;  %v287_v40 = vunpack.c.h.bf16 %v110_v16  ;;  %v236_v37 = vunpack.c.l.bf16 %v85_v20  ;;  %v261_v28 = vunpack.c.h.bf16 %v97_v8 }
  0x8f   :  { %v713_v26 = vadd.f32 %v712_v30, %v516_v7  ;;  %v545_v38 = vmul.f32 %v1090_v41, %v259_v27  ;;  %v742_v42 = vadd.f32 %v741_v32, %v543_v5  ;;  %v237_v43 = vunpack.c.h.bf16 %v85_v20  ;;  %v113_v5 = vld [vmem:[#allocation2 + $0x298] sm:$0xff] }
  0x90   :  { %823 = vadd.xlane.f32.xlu1 %v822_v10  ;;  %v519_v44 = vmul.f32 %v1105_v62, %v233_v13  ;;  %v288_v46 = vunpack.c.l.bf16 %v111_v23  ;;  %v520_v14 = vmul.f32 %v1109_v4, %v234_v25  ;;  %v262_v48 = vunpack.c.l.bf16 %v98_v34 }
  0x91   :  { %v714_v35 = vadd.f32 %v713_v26, %v517_v17  ;;  %v546_v52 = vmul.f32 %v1093_v50, %v260_v29  ;;  %v743_v49 = vadd.f32 %v742_v42, %v544_v63  ;;  %v289_v60 = vunpack.c.h.bf16 %v111_v23 }
  0x92   :  { %v572_v53 = vmul.f32 %v1066_v11, %v286_v19  ;;  %v573_v61 = vmul.f32 %v1068_v12, %v287_v40  ;;  %v521_v45 = vmul.f32 %v1111_v2, %v235_v24  ;;  %v263_v36 = vunpack.c.h.bf16 %v98_v34  ;;  %v100_v12 = vld [vmem:[#allocation2 + $0x230] sm:$0xff]  ;;  %v101_v19 = vld [vmem:[#allocation2 + $0x238] sm:$0xff] }
  0x93   :  { %v715_v56 = vadd.f32 %v714_v35, %v518_v33  ;;  %v547_v3 = vmul.f32 %v1096_v54, %v261_v28  ;;  %v744_v1 = vadd.f32 %v743_v49, %v545_v38  ;;  %v522_v51 = vmul.f32 %v1114_v6, %v236_v37  ;;  %v115_v49 = vld [vmem:[#allocation2 + $0x2a8] sm:$0xff] }
  0x94   :  { %v290_v7 = vunpack.c.l.bf16 %v112_v39  ;;  %v574_v59 = vmul.f32 %v1070_v15, %v288_v46  ;;  %v264_v8 = vunpack.c.l.bf16 %v99_v18  ;;  %v548_v13 = vmul.f32 %v1098_v55, %v262_v48 }
  0x95   :  { %v716_v47 = vadd.f32 %v715_v56, %v519_v44  ;;  %v745_v27 = vadd.f32 %v744_v1, %v546_v52  ;;  %v291_v11 = vunpack.c.h.bf16 %v112_v39  ;;  %v575_v16 = vmul.f32 %v1076_v22, %v289_v60  ;;  %v114_v22 = vld [vmem:[#allocation2 + $0x2a0] sm:$0xff]  ;;  %v116_v1 = vld [vmem:[#allocation2 + $0x2b0] sm:$0xff] }
  0x96   :  { %v774_v10 = vadd.f32 %v573_v61, %v572_v53  ;;  %v523_v20 = vmul.f32 %v1116_v9, %v237_v43  ;;  %v265_v25 = vunpack.c.h.bf16 %v99_v18  ;;  %v549_v17 = vmul.f32 %v1100_v57, %v263_v36 }
  0x97   :  { %v717_v21 = vadd.f32 %v716_v47, %v520_v14  ;;  %v746_v30 = vadd.f32 %v745_v27, %v547_v3  ;;  %v1031_v24 = vmov 0   ;;  %v292_v29 = vunpack.c.l.bf16 %v113_v5 }
  0x98   :  { %998 = vset.pattern.permute.xlu0 %v1031_v24  ;;  %999 = vset.pattern.permute.xlu1 %v1031_v24  ;;  %v576_v63 = vmul.f32 %v1082_v31, %v290_v7  ;;  %v775_v32 = vadd.f32 %v774_v10, %v574_v59  ;;  %v266_v23 = vunpack.c.l.bf16 %v100_v12  ;;  %v550_v33 = vmul.f32 %v1102_v58, %v264_v8 }
  0x99   :  { %v718_v15 = vadd.f32 %v717_v21, %v521_v45  ;;  %v747_v26 = vadd.f32 %v746_v30, %v548_v13  ;;  %v293_v40 = vunpack.c.h.bf16 %v113_v5  ;;  %v577_v37 = vmul.f32 %v1090_v41, %v291_v11  ;;  %v117_v11 = vld [vmem:[#allocation2 + $0x2b8] sm:$0xff] }
  0x9a   :  { %v776_v28 = vadd.f32 %v775_v32, %v575_v16  ;;  %v267_v38 = vunpack.c.h.bf16 %v100_v12  ;;  %v551_v42 = vmul.f32 %v1105_v62, %v265_v25  ;;  %v294_v35 = vunpack.c.l.bf16 %v114_v22 }
  0x9b   :  { %v719_v34 = vadd.f32 %v718_v15, %v522_v51  ;;  %v748_v43 = vadd.f32 %v747_v26, %v549_v17  ;;  %v578_v31 = vmul.f32 %v1093_v50, %v292_v29  ;;  %v268_v14 = vunpack.c.l.bf16 %v101_v19 }
  0x9c   :  { %v777_v46 = vadd.f32 %v776_v28, %v576_v63  ;;  %v552_v48 = vmul.f32 %v1109_v4, %v266_v23  ;;  %v295_v39 = vunpack.c.h.bf16 %v114_v22  ;;  %v579_v56 = vmul.f32 %v1096_v54, %v293_v40 }
  0x9d   :  { %v720_v44 = vadd.f32 %v719_v34, %v523_v20  ;;  %v749_v52 = vadd.f32 %v748_v43, %v550_v33  ;;  %v269_v18 = vunpack.c.h.bf16 %v101_v19  ;;  %v553_v60 = vmul.f32 %v1111_v2, %v267_v38  ;;  %v321_v19 = vld [vmem:[%s1396_s2 + $0x18] sm:$0xff] }
  0x9e   :  { %v778_v41 = vadd.f32 %v777_v46, %v577_v37  ;;  %v296_v61 = vunpack.c.l.bf16 %v115_v49  ;;  %v580_v45 = vmul.f32 %v1098_v55, %v294_v35  ;;  %v554_v50 = vmul.f32 %v1114_v6, %v268_v14  ;;  %v1347_v35 = vld [vmem:[%s1396_s2 + $0x48] sm:$0xff] }
  0x9f   :  { %721 = vadd.xlane.f32.xlu0 %v720_v44  ;;  %v750_v53 = vadd.f32 %v749_v52, %v551_v42  ;;  %v297_v51 = vunpack.c.h.bf16 %v115_v49  ;;  %v581_v47 = vmul.f32 %v1100_v57, %v295_v39  ;;  %v555_v59 = vmul.f32 %v1116_v9, %v269_v18  ;;  %v322_v52 = vld [vmem:[%s1396_s2 + $0x20] sm:$0xff] }
  0xa0   :  { %v779_v36 = vadd.f32 %v778_v41, %v578_v31  ;;  %v298_v8 = vunpack.c.l.bf16 %v116_v1  ;;  %v582_v13 = vmul.f32 %v1102_v58, %v296_v61  ;;  %v299_v21 = vunpack.c.h.bf16 %v116_v1 }
  0xa1   :  { %v751_v3 = vadd.f32 %v750_v53, %v552_v48  ;;  %v583_v55 = vmul.f32 %v1105_v62, %v297_v51  ;;  %v300_v10 = vunpack.c.l.bf16 %v117_v11  ;;  %v301_v57 = vunpack.c.h.bf16 %v117_v11  ;;  %v1329_v62 = vld [vmem:[%s1396_s2] sm:$0xff]  ;;  %v323_v48 = vld [vmem:[%s1396_s2 + $0x28] sm:$0xff] }
  0xa2   :  { %v780_v7 = vadd.f32 %v779_v36, %v579_v56  ;;  %v584_v20 = vmul.f32 %v1109_v4, %v298_v8  ;;  %v585_v17 = vmul.f32 %v1111_v2, %v299_v21  ;;  %v1335_v2 = vld [vmem:[%s1396_s2 + $0x10] sm:$0xff]  ;;  %v325_v36 = vld [vmem:[%s1396_s2 + $0x38] sm:$0xff] }
  0xa3   :  { %v752_v54 = vadd.f32 %v751_v3, %v553_v60  ;;  %v586_v24 = vmul.f32 %v1114_v6, %v300_v10  ;;  %v587_v15 = vmul.f32 %v1116_v9, %v301_v57  ;;  %v319_v9 = vld [vmem:[%s1396_s2 + $0x8] sm:$0xff]  ;;  %v1359_v60 = vld [vmem:[%s1396_s2 + $0x58] sm:$0x7] }
  0xa4   :  { %v781_v27 = vadd.f32 %v780_v7, %v580_v45 }
  0xa5   :  { %v753_v5 = vadd.f32 %v752_v54, %v554_v50  ;;  %v324_v50 = vld [vmem:[%s1396_s2 + $0x30] sm:$0xff] }
  0xa6   :  { %v782_v12 = vadd.f32 %v781_v27, %v581_v47  ;;  %v328_v27 = vld [vmem:[%s1396_s2 + $0x50] sm:$0xff] }
  0xa7   :  { %v754_v16 = vadd.f32 %v753_v5, %v555_v59  ;;  %v326_v59 = vld [vmem:[%s1396_s2 + $0x40] sm:$0xff]  ;;  %s1032_s2 = smov 127  }
  0xa8   :  { %v783_v25 = vadd.f32 %v782_v12, %v582_v13 }
  0xa9   :  { %755 = vadd.xlane.f32.xlu0 %v754_v16 }
  0xaa   :  { %v784_v30 = vadd.f32 %v783_v25, %v583_v55 }
  0xac   :  { %v785_v58 = vadd.f32 %v784_v30, %v584_v20 }
  0xae   :  { %v786_v29 = vadd.f32 %v785_v58, %v585_v17 }
  0xb0   :  { %v787_v63 = vadd.f32 %v786_v29, %v586_v24 }
  0xb2   :  { %v788_v32 = vadd.f32 %v787_v63, %v587_v15 }
  0xb4   :  { %789 = vadd.xlane.f32.xlu0 %v788_v32 }
  0xbe   :  { %v654_v6 = vpop.xlane.xlu1 %653 }
  0xbf   :  { %v827_v22 = vadd.f32 %v654_v6, %v1335_v2 }
  0xc1   :  { %v839_v28 = vmax.f32 %v827_v22, 0.0 }
  0xc6   :  { %v620_v4 = vpop.xlane.xlu0 %619 }
  0xc7   :  { %v825_v23 = vadd.f32 %v620_v4, %v1329_v62 }
  0xc9   :  { %v837_v33 = vmax.f32 %v825_v23, 0.0 }
  0xcb   :  { %851 = vperm.xlu0 %998, %v837_v33  }
  0xd1   :  { %v671_v37 = vpop.xlane.xlu1 %670 }
  0xd2   :  { %v828_v38 = vadd.f32 %v671_v37, %v321_v19 }
  0xd4   :  { %v840_v42 = vmax.f32 %v828_v38, 0.0 }
  0xdd   :  { %v637_v26 = vpop.xlane.xlu0 %636 }
  0xde   :  { %v826_v34 = vadd.f32 %v637_v26, %v319_v9 }
  0xe0   :  { %v838_v40 = vmax.f32 %v826_v34, 0.0 }
  0xe2   :  { %856 = vperm.xlu1 %999, %v838_v40  }
  0xe6   :  { %861 = vperm.xlu1 %999, %v839_v28  }
  0xe9   :  { %v705_v43 = vpop.xlane.xlu1 %704 }
  0xea   :  { %866 = vperm.xlu1 %999, %v840_v42   ;;  %v830_v39 = vadd.f32 %v705_v43, %v323_v48 }
  0xec   :  { %v842_v18 = vmax.f32 %v830_v39, 0.0 }
  0xf4   :  { %v739_v44 = vpop.xlane.xlu1 %738 }
  0xf5   :  { %v832_v1 = vadd.f32 %v739_v44, %v325_v36 }
  0xf7   :  { %v844_v7 = vmax.f32 %v832_v1, 0.0 }
 0x100   :  { %v773_v31 = vpop.xlane.xlu1 %772 }
 0x101   :  { %v834_v46 = vadd.f32 %v773_v31, %v1347_v35 }
 0x103   :  { %v846_v14 = vmax.f32 %v834_v46, 0.0 }
 0x105   :  { %896 = vperm.xlu0 %998, %v846_v14  }
 0x10b   :  { %v688_v49 = vpop.xlane.xlu0 %687 }
 0x10c   :  { %v829_v56 = vadd.f32 %v688_v49, %v322_v52 }
 0x10e   :  { %v841_v41 = vmax.f32 %v829_v56, 0.0 }
 0x110   :  { %871 = vperm.xlu1 %999, %v841_v41  }
 0x114   :  { %876 = vperm.xlu1 %999, %v842_v18  }
 0x119   :  { %v824_v53 = vpop.xlane.xlu1 %823 }
 0x11a   :  { %v836_v61 = vadd.f32 %v824_v53, %v1359_v60 }
 0x11c   :  { %v848_v45 = vmax.f32 %v836_v61, 0.0 }
 0x11e   :  { %906 = vperm.xlu0 %998, %v848_v45  }
 0x128   :  { %v722_v3 = vpop.xlane.xlu0 %721 }
 0x129   :  { %v831_v51 = vadd.f32 %v722_v3, %v324_v50 }
 0x12b   :  { %v843_v47 = vmax.f32 %v831_v51, 0.0 }
 0x12d   :  { %881 = vperm.xlu1 %999, %v843_v47  }
 0x131   :  { %886 = vperm.xlu1 %999, %v844_v7  }
 0x132   :  { %v756_v54 = vpop.xlane.xlu0 %755 }
 0x133   :  { %v833_v8 = vadd.f32 %v756_v54, %v326_v59 }
 0x135   :  { %v845_v13 = vmax.f32 %v833_v8, 0.0 }
 0x137   :  { %891 = vperm.xlu1 %999, %v845_v13  }
 0x13d   :  { %v790_v5 = vpop.xlane.xlu0 %789 }
 0x13e   :  { %v835_v11 = vadd.f32 %v790_v5, %v328_v27 }
 0x140   :  { %v847_v21 = vmax.f32 %v835_v11, 0.0 }
 0x142   :  { %901 = vperm.xlu1 %999, %v847_v21  }
 0x146   :  { %v852_v25 = vpop.permute.xlu0 %851 }
 0x147   :  { %v909_v17 = vmul.f32 %v852_v25, %v1329_v62 }
 0x149   :  { %v922_v29 = vsel %vm921_vm1, %v909_v17, 0.0 }
 0x15d   :  { %v857_v55 = vpop.permute.xlu1 %856 }
 0x15e   :  { %v910_v57 = vmul.f32 %v857_v55, %v319_v9 }
 0x160   :  { %v923_v58 = vsel %vm921_vm1, %v910_v57, 0.0 }
 0x161   :  { %v862_v12 = vpop.permute.xlu1 %861  ;;  %v924_v4 = vadd.f32 %v923_v58, %v922_v29 }
 0x162   :  { %v911_v30 = vmul.f32 %v862_v12, %v1335_v2 }
 0x164   :  { %v925_v63 = vsel %vm921_vm1, %v911_v30, 0.0 }
 0x165   :  { %v867_v16 = vpop.permute.xlu1 %866  ;;  %v926_v9 = vadd.f32 %v925_v63, %v924_v4 }
 0x166   :  { %v912_v15 = vmul.f32 %v867_v16, %v321_v19 }
 0x168   :  { %v927_v23 = vsel %vm921_vm1, %v912_v15, 0.0  ;;  %v954_v15 = vand.u32 127, %v332_v0 }
 0x169   :  { %v928_v2 = vadd.f32 %v927_v23, %v926_v9 }
 0x16a   :  { %vm974_vm4 = vcmp.eq.s32.totalorder %v954_v15, 0 }
 0x180   :  { %v897_v43 = vpop.permute.xlu0 %896 }
 0x181   :  { %v918_v14 = vmul.f32 %v897_v43, %v1347_v35 }
 0x183   :  { %v939_v49 = vsel %vm921_vm1, %v918_v14, 0.0 }
 0x18b   :  { %v872_v10 = vpop.permute.xlu1 %871 }
 0x18c   :  { %v913_v32 = vmul.f32 %v872_v10, %v322_v52 }
 0x18e   :  { %v929_v62 = vsel %vm921_vm1, %v913_v32, 0.0 }
 0x18f   :  { %v877_v20 = vpop.permute.xlu1 %876  ;;  %v930_v40 = vadd.f32 %v929_v62, %v928_v2 }
 0x190   :  { %v914_v33 = vmul.f32 %v877_v20, %v323_v48 }
 0x192   :  { %v931_v22 = vsel %vm921_vm1, %v914_v33, 0.0 }
 0x193   :  { %v932_v28 = vadd.f32 %v931_v22, %v930_v40 }
 0x199   :  { %v907_v52 = vpop.permute.xlu0 %906 }
 0x19a   :  { %v920_v41 = vmul.f32 %v907_v52, %v1359_v60 }
 0x19c   :  { %v944_v45 = vsel %vm943_vm2, %v920_v41, 0.0 }
 0x1a8   :  { %v882_v24 = vpop.permute.xlu1 %881 }
 0x1a9   :  { %v915_v26 = vmul.f32 %v882_v24, %v324_v50 }
 0x1ab   :  { %v933_v19 = vsel %vm921_vm1, %v915_v26, 0.0 }
 0x1ac   :  { %v887_v6 = vpop.permute.xlu1 %886  ;;  %v934_v44 = vadd.f32 %v933_v19, %v932_v28 }
 0x1ad   :  { %v916_v34 = vmul.f32 %v887_v6, %v325_v36 }
 0x1af   :  { %v935_v42 = vsel %vm921_vm1, %v916_v34, 0.0 }
 0x1b0   :  { %v936_v46 = vadd.f32 %v935_v42, %v934_v44 }
 0x1b2   :  { %v892_v37 = vpop.permute.xlu1 %891 }
 0x1b3   :  { %v917_v38 = vmul.f32 %v892_v37, %v326_v59 }
 0x1b5   :  { %v937_v31 = vsel %vm921_vm1, %v917_v38, 0.0 }
 0x1b6   :  { %v938_v48 = vadd.f32 %v937_v31, %v936_v46 }
 0x1b8   :  { %v940_v56 = vadd.f32 %v939_v49, %v938_v48 }
 0x1bd   :  { %v902_v39 = vpop.permute.xlu1 %901 }
 0x1be   :  { %v919_v18 = vmul.f32 %v902_v39, %v328_v27 }
 0x1c0   :  { %v941_v53 = vsel %vm921_vm1, %v919_v18, 0.0 }
 0x1c1   :  { %v942_v61 = vadd.f32 %v941_v53, %v940_v56 }
 0x1c3   :  { %v945_v36 = vadd.f32 %v944_v45, %v942_v61 }
 0x1c5   :  { %v946_v50 = vrot.slane %v945_v36, 4 }
 0x1c7   :  { %v947_v3 = vadd.f32 %v946_v50, %v945_v36 }
 0x1c9   :  { %v948_v1 = vrot.slane %v947_v3, 2 }
 0x1cb   :  { %v949_v51 = vadd.f32 %v948_v1, %v947_v3 }
 0x1cd   :  { %v950_v35 = vrot.slane %v949_v51, 1 }
 0x1cf   :  { %v951_v47 = vadd.f32 %v950_v35, %v949_v51 }
 0x1d1   :  { %v952_v7 = vadd.f32 %v951_v47, %v1359_v60 }
 0x1d3   :  { %v955_v59 = vmul.f32 0.5, %v952_v7  ;;  %v960_v54 = vand.u32 2147483647, %v952_v7  ;;  %v959_v17 = vmax.f32 %v952_v7, 0.0 }
 0x1d5   :  { %1000 = vtanh.f32 %v955_v59  ;;  %v961_v8 = vsub.f32 0.0, %v960_v54 }
 0x1d7   :  { %v962_v13 = vmul.f32 1.442695, %v961_v8 }
 0x1d9   :  { %1002 = vpow2.f32 %v962_v13 }
 0x1e2   :  { %v1001_v27 = vpop.eup %1000 }
 0x1e3   :  { %v957_v5 = vadd.f32 1.0, %v1001_v27 }
 0x1e5   :  { %v958_v11 = vmul.f32 0.5, %v957_v5 }
 0x1e6   :  { %v1003_v21 = vpop.eup %1002 }
 0x1e7   :  { %v976_v55 = vrot.slane %v958_v11, 2  ;;  %v964_v12 = vadd.f32 1.0, %v1003_v21  ;;  %v967_v16 = vmul.f32 -0.5, %v1003_v21  ;;  %v970_v20 = vand.u32 2147483647, %v1003_v21 }
 0x1e9   :  { %977 = vrot.lane.b32.xlu1 %v976_v55, %s1032_s2  ;;  %1004 = vlog2.f32 %v964_v12  ;;  %v968_v10 = vadd.f32 1.0, %v967_v16  ;;  %vm971_vm3 = vcmp.lt.f32.partialorder %v970_v20, 0.0004427343 }
 0x1eb   :  { %v969_v57 = vmul.f32 %v1003_v21, %v968_v10 }
 0x1f6   :  { %v1005_v25 = vpop.eup %1004 }
 0x1f7   :  { %v966_v60 = vmul.f32 0.6931472, %v1005_v25 }
 0x1f9   :  { %v972_v30 = vsel %vm971_vm3, %v969_v57, %v966_v60 }
 0x1fa   :  { %v973_v24 = vadd.f32 %v972_v30, %v959_v17 }
 0x1fc   :  { %v981_v58 = vrot.slane %v973_v24, 2 }
 0x1fe   :  { %982 = vrot.lane.b32.xlu0 %v981_v58, %s1032_s2 }
 0x25b   :  { %v978_v29 = vpop.permute.xlu1 %977 }
 0x270   :  { %v983_v63 = vpop.permute.xlu0 %982 }
 0x271   :  { %v985_v32 = vsel %vm974_vm4, %v978_v29, %v983_v63 }
 0x272   :  { %987 = vst.msk [vmem:[%s1397_s3] sm:$0x1] %vm986_vm5, %v985_v32 }
 0x273   :  { %992 = vsyncpa [#allocation3], 1 }

</bundles_post_ra>
